<compile_context>
chip_gen: v7x
topology: tpu7x:2x2x1
jax: 0.10.0
libtpu: 0.0.40
codegen_flags: <defaults>
</compile_context>

<pallas_src>
import functools

import jax
import jax.numpy as jnp
from jax import lax
from jax.experimental import pallas as pl
from jax.experimental.pallas import tpu as pltpu


def _encoding_kernel(x_ref, cws_ref, sc2_ref, s_ref, cw_ref,
                     e_ref, a_ref, acc_xa_ref, acc_as_ref, *, n_valid, tn):
    # x_ref  : (1, C, TN)   input features, native dtype (C sublanes, N lanes)
    # cws_ref: (K, C)       -2 * scale * codewords      (x dtype, MXU operand)
    # sc2_ref: (K, 1)       scale * ||codewords||^2     (f32, hoisted)
    # s_ref  : (K, 1)       scale                        (f32)
    # cw_ref : (K, C)       codewords                    (f32, finalize only)
    # e_ref  : (1, 1, K, C) partial residual encoding (written at last ni)
    # a_ref  : (1, K, TN)   assignment weights (lane-dense, x dtype)
    # acc_xa : (C, K) f32   accumulates sum_n x[c,n] * a[k,n]
    # acc_as : (K, 1) f32   accumulates sum_n a[k,n]
    ni = pl.program_id(2)

    @pl.when(ni == 0)
    def _():
        acc_xa_ref[...] = jnp.zeros_like(acc_xa_ref)
        acc_as_ref[...] = jnp.zeros_like(acc_as_ref)

    cws = cws_ref[...]
    sc2 = sc2_ref[...]
    s = s_ref[...]

    def tile_math(x, a_mask):
        xf = x.astype(jnp.float32)
        x2 = jnp.sum(xf * xf, axis=0, keepdims=True)                  # (1, TN)
        # -2*scale * (codewords @ x)  -> (K, TN)   [MXU, contraction over C]
        xc = lax.dot_general(cws, x, (((1,), (0,)), ((), ())),
                             preferred_element_type=jnp.float32)
        dist = s * x2 + sc2 + xc                                      # (K, TN)

        # softmax over the codeword axis K (sublane axis 0)
        m = jnp.max(dist, axis=0, keepdims=True)                      # (1, TN)
        ex = jnp.exp(dist - m)                                        # (K, TN)
        denom = jnp.sum(ex, axis=0, keepdims=True)                    # (1, TN)
        # approx=False keeps the 1e-4 check against the f32 reference tight.
        a = ex * pl.reciprocal(denom, approx=False)                   # (K, TN)
        a_ref[0] = a.astype(a_ref.dtype)

        # sum_n x[c,n]*a[k,n] -> (C, K): the compiler transposes A (K rows),
        # not x (C rows), so per-tile XLU traffic is halved.
        xa = lax.dot_general(x, a.astype(x.dtype), (((1,), (1,)), ((), ())),
                             preferred_element_type=jnp.float32)
        acc_xa_ref[...] += xa
        a_s = a if a_mask is None else jnp.where(a_mask, a, 0.0)
        acc_as_ref[...] += jnp.sum(a_s, axis=1, keepdims=True)        # (K, 1)

    if n_valid % tn != 0:
        # The ragged tail lives only in the last global N tile: columns past
        # n_valid are out-of-bounds reads (undefined), so zero x there and
        # mask A out of the column-sum; all other tiles stay mask-free.
        is_last = jnp.logical_and(pl.program_id(1) == pl.num_programs(1) - 1,
                                  ni == pl.num_programs(2) - 1)

        @pl.when(jnp.logical_not(is_last))
        def _():
            tile_math(x_ref[0], None)

        @pl.when(is_last)
        def _():
            col = lax.broadcasted_iota(jnp.int32, (1, tn), 1)
            valid = col < (n_valid % tn)
            x = jnp.where(valid, x_ref[0], jnp.zeros((), x_ref.dtype))
            tile_math(x, valid)
    else:
        tile_math(x_ref[0], None)

    @pl.when(ni == pl.num_programs(2) - 1)
    def _():
        # E[k,c] = sum_n A[k,n] x[c,n] - (sum_n A[k,n]) cw[k,c]
        e_ref[0, 0] = (acc_xa_ref[...].T
                       - acc_as_ref[...] * cw_ref[...]).astype(e_ref.dtype)


def encoding3d_forward(x, codewords, scale, *, tn=None):
    """x: (B, C, D, H, W); codewords: (K, C); scale: (K,).

    Returns (E: (B, K, C) f32, coefA: (B, K, D, H, W) in x.dtype), with
    eval-mode (identity Dropout3d) semantics.
    """
    B, C, D, H, W = x.shape
    K = codewords.shape[0]
    N = D * H * W

    # Channels stay on sublanes, spatial N on lanes: plain reshape, no
    # transpose, no dtype widening (bf16 inputs stay bf16 over HBM / MXU).
    x_bcn = x.reshape(B, C, N)
    itemsize = jnp.dtype(x.dtype).itemsize

    # Tiny (K,C)/(K,1) parameter prep, hoisted out of the kernel.
    cw = codewords.astype(jnp.float32)
    s = scale.astype(jnp.float32).reshape(K, 1)
    sc2 = s * jnp.sum(cw * cw, axis=-1, keepdims=True)      # scale * ||cw||^2
    cws = (-2.0 * s * cw).astype(x.dtype)                   # MXU operand

    # ---- N-tile sizing from VMEM arithmetic (v7x has only 64 MiB VMEM) ----
    try:
        vmem_cap = int(getattr(pltpu.get_tpu_info(), "vmem_capacity_bytes",
                               64 * 1024 * 1024))
    except Exception:
        vmem_cap = 64 * 1024 * 1024
    tile_budget = min(vmem_cap // 3, 32 * 1024 * 1024)
    vmem_limit = int(min(vmem_cap * 3 // 4, 96 * 1024 * 1024))

    # Live bytes per N column: double-buffered x + coefA blocks plus roughly
    # f32 elementwise intermediates (x2/xc/dist/ex/a).
    per_col = 2 * C * itemsize + 2 * K * itemsize + (C + 5 * K) * 4
    tn_max = max(128, tile_budget // per_col)
    if tn is None:
        tn = N if N <= tn_max else min((tn_max // 128) * 128, 32768)
    if tn >= N:
        tn = N                                   # single tile: no ragged tail
    else:
        tn = max(128, (tn // 128) * 128)         # lane-dense (.,128) tile
    num_n = pl.cdiv(N, tn)

    # Megacore coverage when B == 1: split N over a second "parallel" axis.
    n_outer = 2 if (B == 1 and num_n >= 2 and num_n % 2 == 0) else 1
    n_inner = num_n // n_outer

    kernel = functools.partial(_encoding_kernel, n_valid=N, tn=tn)

    e_partial, a_out = pl.pallas_call(
        kernel,
        out_shape=(
            jax.ShapeDtypeStruct((B, n_outer, K, C), jnp.float32),
            jax.ShapeDtypeStruct((B, K, N), x.dtype),
        ),
        grid=(B, n_outer, n_inner),
        in_specs=[
            pl.BlockSpec((1, C, tn),
                         lambda b, no, ni, _ni=n_inner: (b, 0, no * _ni + ni)),
            pl.BlockSpec((K, C), lambda b, no, ni: (0, 0)),
            pl.BlockSpec((K, 1), lambda b, no, ni: (0, 0)),
            pl.BlockSpec((K, 1), lambda b, no, ni: (0, 0)),
            pl.BlockSpec((K, C), lambda b, no, ni: (0, 0)),
        ],
        out_specs=(
            pl.BlockSpec((1, 1, K, C), lambda b, no, ni: (b, no, 0, 0)),
            pl.BlockSpec((1, K, tn),
                         lambda b, no, ni, _ni=n_inner: (b, 0, no * _ni + ni)),
        ),
        scratch_shapes=[pltpu.VMEM((C, K), jnp.float32),
                        pltpu.VMEM((K, 1), jnp.float32)],
        compiler_params=pltpu.CompilerParams(
            dimension_semantics=("parallel", "parallel", "arbitrary"),
            vmem_limit_bytes=vmem_limit,
        ),
    )(x_bcn, cws, sc2, s, cw)

    e = jnp.sum(e_partial, axis=1)          # (B,K,C); trivial when n_outer==1
    coefA = a_out.reshape(B, K, D, H, W)
    return e, coefA


def _reference(x, codewords, scale):
    B, C, D, H, W = x.shape
    K = codewords.shape[0]
    N = D * H * W
    X = jnp.transpose(x.reshape(B, C, N), (0, 2, 1)).astype(jnp.float32)
    cw = codewords.astype(jnp.float32)
    x2 = jnp.sum(X * X, axis=-1, keepdims=True)
    c2 = jnp.sum(cw * cw, axis=-1)[None, None, :]
    xc = jnp.einsum("bnc,kc->bnk", X, cw)
    dist = scale[None, None, :] * (x2 + c2 - 2.0 * xc)
    A = jax.nn.softmax(dist, axis=2)
    E = jnp.einsum("bnk,bnc->bkc", A, X) - jnp.sum(A, axis=1)[..., None] * cw[None]
    coefA = jnp.transpose(A, (0, 2, 1)).reshape(B, K, D, H, W)
    return E, coefA


def _check(key, B, C, K, Dd, Hh, Ww, tn=None):
    k_x, k_cw, k_s = jax.random.split(key, 3)
    x = jax.random.normal(k_x, (B, C, Dd, Hh, Ww), dtype=jnp.float32)

    # deterministic parameter init matching reset_params():
    #   codewords ~ U(-std1, std1), std1 = 1/sqrt(K*C);  scale ~ U(-1, 0)
    std1 = 1.0 / (K * C) ** 0.5
    codewords = jax.random.uniform(k_cw, (K, C), jnp.float32,
                                   minval=-std1, maxval=std1)
    scale = jax.random.uniform(k_s, (K,), jnp.float32, minval=-1.0, maxval=0.0)

    E, coefA = encoding3d_forward(x, codewords, scale, tn=tn)
    E, coefA = jax.block_until_ready((E, coefA))

    E_ref, coefA_ref = _reference(x, codewords, scale)
    assert E.shape == (B, K, C) and coefA.shape == (B, K, Dd, Hh, Ww)
    assert jnp.allclose(E, E_ref, atol=1e-4, rtol=1e-4), "E mismatch"
    assert jnp.allclose(coefA, coefA_ref, atol=1e-4, rtol=1e-4), "coefA mismatch"


if __name__ == "__main__":
    key = jax.random.PRNGKey(0)
    k1, k2, k3 = jax.random.split(key, 3)

    # Auto tiling: single tile per batch (full-N block, no pad / mask path).
    _check(k1, B=2, C=32, K=16, Dd=4, Hh=4, Ww=4)
    # Forced small tile: multi-tile E accumulation + ragged last tile
    # (N=320, TN=128 -> tail of 64 handled in-kernel, no wrapper pad/slice).
    _check(k2, B=2, C=32, K=16, Dd=4, Hh=8, Ww=10, tn=128)
    # B=1 with forced small tile: exercises the N-outer "parallel" split
    # (v7x megacore coverage) and the partial-E reduction in the wrapper.
    _check(k3, B=1, C=32, K=16, Dd=4, Hh=8, Ww=8, tn=128)

    print("KERNEL_OK")
</pallas_src>

<mosaic_0001>
module attributes {stable_mosaic.version = 11 : i64} {
  func.func @_encoding_kernel(%arg0: i32, %arg1: i32, %arg2: i32, %arg3: memref<1x32x64xf32, #tpu.memory_space<vmem>>, %arg4: memref<16x32xf32, #tpu.memory_space<vmem>>, %arg5: memref<16x1xf32, #tpu.memory_space<vmem>>, %arg6: memref<16x1xf32, #tpu.memory_space<vmem>>, %arg7: memref<16x32xf32, #tpu.memory_space<vmem>>, %arg8: memref<1x1x16x32xf32, #tpu.memory_space<vmem>>, %arg9: memref<1x16x64xf32, #tpu.memory_space<vmem>>, %arg10: memref<32x16xf32, #tpu.memory_space<vmem>>, %arg11: memref<16x1xf32, #tpu.memory_space<vmem>>) attributes {dimension_semantics = [#tpu.dimension_semantics<parallel>, #tpu.dimension_semantics<parallel>, #tpu.dimension_semantics<arbitrary>], iteration_bounds = array<i64: 2, 1, 1>, scalar_prefetch = 0 : i64, scratch_operands = 2 : i64, tpu.core_type = #tpu.core_type<tc>, window_params = [{transform_indices = @transform_0, window_bounds = array<i64: 1, 32, 64>}, {pipeline_mode = #tpu.pipeline_mode<synchronous>, transform_indices = @transform_1, window_bounds = array<i64: 16, 32>}, {pipeline_mode = #tpu.pipeline_mode<synchronous>, transform_indices = @transform_2, window_bounds = array<i64: 16, 1>}, {pipeline_mode = #tpu.pipeline_mode<synchronous>, transform_indices = @transform_3, window_bounds = array<i64: 16, 1>}, {pipeline_mode = #tpu.pipeline_mode<synchronous>, transform_indices = @transform_4, window_bounds = array<i64: 16, 32>}, {transform_indices = @transform_5, window_bounds = array<i64: 1, 1, 16, 32>}, {transform_indices = @transform_6, window_bounds = array<i64: 1, 16, 64>}]} {
    %c0_i32 = arith.constant 0 : i32
    %0 = arith.cmpi eq, %arg2, %c0_i32 : i32
    %1 = arith.extui %0 : i1 to i32
    %c0_i32_0 = arith.constant 0 : i32
    %2 = arith.cmpi ne, %1, %c0_i32_0 : i32
    scf.if %2 {
      %cst_27 = arith.constant 0.000000e+00 : f32
      %43 = vector.broadcast %cst_27 : f32 to vector<32x16xf32>
      %c0_28 = arith.constant 0 : index
      %c0_29 = arith.constant 0 : index
      %44 = vector.load %arg10[%c0_28, %c0_29] : memref<32x16xf32, #tpu.memory_space<vmem>>, vector<32x16xf32>
      tpu.vector_store %arg10[%c0_28, %c0_29], %43 {strides = array<i32>} : memref<32x16xf32, #tpu.memory_space<vmem>>, vector<32x16xf32>,
      %cst_30 = arith.constant 0.000000e+00 : f32
      %45 = vector.broadcast %cst_30 : f32 to vector<16x1xf32>
      %c0_31 = arith.constant 0 : index
      %c0_32 = arith.constant 0 : index
      %46 = vector.load %arg11[%c0_31, %c0_32] : memref<16x1xf32, #tpu.memory_space<vmem>>, vector<16x1xf32>
      tpu.vector_store %arg11[%c0_31, %c0_32], %45 {strides = array<i32>} : memref<16x1xf32, #tpu.memory_space<vmem>>, vector<16x1xf32>,
    } else {
    }
    %c0 = arith.constant 0 : index
    %c0_1 = arith.constant 0 : index
    %3 = vector.load %arg4[%c0, %c0_1] : memref<16x32xf32, #tpu.memory_space<vmem>>, vector<16x32xf32>
    %c0_2 = arith.constant 0 : index
    %c0_3 = arith.constant 0 : index
    %4 = vector.load %arg5[%c0_2, %c0_3] : memref<16x1xf32, #tpu.memory_space<vmem>>, vector<16x1xf32>
    %c0_4 = arith.constant 0 : index
    %c0_5 = arith.constant 0 : index
    %5 = vector.load %arg6[%c0_4, %c0_5] : memref<16x1xf32, #tpu.memory_space<vmem>>, vector<16x1xf32>
    %c0_6 = arith.constant 0 : index
    %c0_7 = arith.constant 0 : index
    %c0_8 = arith.constant 0 : index
    %6 = vector.load %arg3[%c0_6, %c0_7, %c0_8] : memref<1x32x64xf32, #tpu.memory_space<vmem>>, vector<1x32x64xf32>
    %7 = vector.shape_cast %6 : vector<1x32x64xf32> to vector<32x64xf32>
    %8 = arith.mulf %7, %7 : vector<32x64xf32>
    %cst = arith.constant dense<0.000000e+00> : vector<64xf32>
    %9 = vector.multi_reduction <add>, %8, %cst [0] : vector<32x64xf32> to vector<64xf32>
    %10 = vector.shape_cast %9 : vector<64xf32> to vector<1x64xf32>
    %cst_9 = arith.constant dense<0.000000e+00> : vector<16x64xf32>
    %11 = tpu.matmul %3, %7, %cst_9 {dimension_numbers = #tpu.dot_dimension_numbers<[1], [0], [0], [1], [0, 0, 1, 1], [], []>} : vector<16x32xf32>, vector<32x64xf32>, vector<16x64xf32> -> vector<16x64xf32>
    %12 = vector.broadcast %5 : vector<16x1xf32> to vector<16x64xf32>
    %13 = vector.broadcast %10 : vector<1x64xf32> to vector<16x64xf32>
    %14 = arith.mulf %12, %13 : vector<16x64xf32>
    %15 = vector.broadcast %4 : vector<16x1xf32> to vector<16x64xf32>
    %16 = arith.addf %14, %15 : vector<16x64xf32>
    %17 = arith.addf %16, %11 : vector<16x64xf32>
    %cst_10 = arith.constant dense<0xFF800000> : vector<64xf32>
    %18 = vector.multi_reduction <maximumf>, %17, %cst_10 [0] : vector<16x64xf32> to vector<64xf32>
    %19 = vector.shape_cast %18 : vector<64xf32> to vector<1x64xf32>
    %20 = vector.broadcast %19 : vector<1x64xf32> to vector<16x64xf32>
    %21 = arith.subf %17, %20 : vector<16x64xf32>
    %22 = math.exp %21 : vector<16x64xf32>
    %cst_11 = arith.constant dense<0.000000e+00> : vector<64xf32>
    %23 = vector.multi_reduction <add>, %22, %cst_11 [0] : vector<16x64xf32> to vector<64xf32>
    %24 = vector.shape_cast %23 : vector<64xf32> to vector<1x64xf32>
    %25 = tpu.reciprocal %24 : vector<1x64xf32> -> vector<1x64xf32>
    %26 = vector.broadcast %25 : vector<1x64xf32> to vector<16x64xf32>
    %27 = arith.mulf %22, %26 : vector<16x64xf32>
    %c0_12 = arith.constant 0 : index
    %c0_13 = arith.constant 0 : index
    %c0_14 = arith.constant 0 : index
    %28 = vector.load %arg9[%c0_12, %c0_13, %c0_14] : memref<1x16x64xf32, #tpu.memory_space<vmem>>, vector<1x16x64xf32>
    %29 = vector.shape_cast %28 : vector<1x16x64xf32> to vector<16x64xf32>
    %30 = vector.shape_cast %27 : vector<16x64xf32> to vector<1x16x64xf32>
    tpu.vector_store %arg9[%c0_12, %c0_13, %c0_14], %30 {strides = array<i32>} : memref<1x16x64xf32, #tpu.memory_space<vmem>>, vector<1x16x64xf32>,
    %cst_15 = arith.constant dense<0.000000e+00> : vector<32x16xf32>
    %31 = tpu.matmul %7, %27, %cst_15 {dimension_numbers = #tpu.dot_dimension_numbers<[1], [1], [0], [0], [0, 0, 1, 0], [], []>} : vector<32x64xf32>, vector<16x64xf32>, vector<32x16xf32> -> vector<32x16xf32>
    %c0_16 = arith.constant 0 : index
    %c0_17 = arith.constant 0 : index
    %32 = vector.load %arg10[%c0_16, %c0_17] : memref<32x16xf32, #tpu.memory_space<vmem>>, vector<32x16xf32>
    %33 = arith.addf %32, %31 : vector<32x16xf32>
    %c0_18 = arith.constant 0 : index
    %c0_19 = arith.constant 0 : index
    %34 = vector.load %arg10[%c0_18, %c0_19] : memref<32x16xf32, #tpu.memory_space<vmem>>, vector<32x16xf32>
    tpu.vector_store %arg10[%c0_18, %c0_19], %33 {strides = array<i32>} : memref<32x16xf32, #tpu.memory_space<vmem>>, vector<32x16xf32>,
    %c0_20 = arith.constant 0 : index
    %c0_21 = arith.constant 0 : index
    %35 = vector.load %arg11[%c0_20, %c0_21] : memref<16x1xf32, #tpu.memory_space<vmem>>, vector<16x1xf32>
    %cst_22 = arith.constant dense<0.000000e+00> : vector<16xf32>
    %36 = vector.multi_reduction <add>, %27, %cst_22 [1] : vector<16x64xf32> to vector<16xf32>
    %37 = vector.shape_cast %36 : vector<16xf32> to vector<16x1xf32>
    %38 = arith.addf %35, %37 : vector<16x1xf32>
    %c0_23 = arith.constant 0 : index
    %c0_24 = arith.constant 0 : index
    %39 = vector.load %arg11[%c0_23, %c0_24] : memref<16x1xf32, #tpu.memory_space<vmem>>, vector<16x1xf32>
    tpu.vector_store %arg11[%c0_23, %c0_24], %38 {strides = array<i32>} : memref<16x1xf32, #tpu.memory_space<vmem>>, vector<16x1xf32>,
    %c0_i32_25 = arith.constant 0 : i32
    %40 = arith.cmpi eq, %arg2, %c0_i32_25 : i32
    %41 = arith.extui %40 : i1 to i32
    %c0_i32_26 = arith.constant 0 : i32
    %42 = arith.cmpi ne, %41, %c0_i32_26 : i32
    scf.if %42 {
      %c0_27 = arith.constant 0 : index
      %c0_28 = arith.constant 0 : index
      %43 = vector.load %arg10[%c0_27, %c0_28] : memref<32x16xf32, #tpu.memory_space<vmem>>, vector<32x16xf32>
      %44 = tpu.transpose %43, [1, 0] : vector<32x16xf32> -> vector<16x32xf32>
      %c0_29 = arith.constant 0 : index
      %c0_30 = arith.constant 0 : index
      %45 = vector.load %arg11[%c0_29, %c0_30] : memref<16x1xf32, #tpu.memory_space<vmem>>, vector<16x1xf32>
      %c0_31 = arith.constant 0 : index
      %c0_32 = arith.constant 0 : index
      %46 = vector.load %arg7[%c0_31, %c0_32] : memref<16x32xf32, #tpu.memory_space<vmem>>, vector<16x32xf32>
      %47 = vector.broadcast %45 : vector<16x1xf32> to vector<16x32xf32>
      %48 = arith.mulf %47, %46 : vector<16x32xf32>
      %49 = arith.subf %44, %48 : vector<16x32xf32>
      %c0_33 = arith.constant 0 : index
      %c0_34 = arith.constant 0 : index
      %c0_35 = arith.constant 0 : index
      %c0_36 = arith.constant 0 : index
      %50 = vector.load %arg8[%c0_33, %c0_34, %c0_35, %c0_36] : memref<1x1x16x32xf32, #tpu.memory_space<vmem>>, vector<1x1x16x32xf32>
      %51 = vector.shape_cast %50 : vector<1x1x16x32xf32> to vector<16x32xf32>
      %52 = vector.shape_cast %49 : vector<16x32xf32> to vector<1x1x16x32xf32>
      tpu.vector_store %arg8[%c0_33, %c0_34, %c0_35, %c0_36], %52 {strides = array<i32>} : memref<1x1x16x32xf32, #tpu.memory_space<vmem>>, vector<1x1x16x32xf32>,
    } else {
    }
    return
  }
  func.func @transform_0(%arg0: i32, %arg1: i32, %arg2: i32) -> (i32, i32, i32) {
    %c1_i32 = arith.constant 1 : i32
    %0 = arith.muli %arg1, %c1_i32 : i32
    %1 = arith.addi %0, %arg2 : i32
    %c0_i32 = arith.constant 0 : i32
    %c0_i32_0 = arith.constant 0 : i32
    return %arg0, %c0_i32, %1 : i32, i32, i32
  }
  func.func @transform_1(%arg0: i32, %arg1: i32, %arg2: i32) -> (i32, i32) {
    %c0_i32 = arith.constant 0 : i32
    %c0_i32_0 = arith.constant 0 : i32
    %c0_i32_1 = arith.constant 0 : i32
    return %c0_i32, %c0_i32_0 : i32, i32
  }
  func.func @transform_2(%arg0: i32, %arg1: i32, %arg2: i32) -> (i32, i32) {
    %c0_i32 = arith.constant 0 : i32
    %c0_i32_0 = arith.constant 0 : i32
    %c0_i32_1 = arith.constant 0 : i32
    return %c0_i32, %c0_i32_0 : i32, i32
  }
  func.func @transform_3(%arg0: i32, %arg1: i32, %arg2: i32) -> (i32, i32) {
    %c0_i32 = arith.constant 0 : i32
    %c0_i32_0 = arith.constant 0 : i32
    %c0_i32_1 = arith.constant 0 : i32
    return %c0_i32, %c0_i32_0 : i32, i32
  }
  func.func @transform_4(%arg0: i32, %arg1: i32, %arg2: i32) -> (i32, i32) {
    %c0_i32 = arith.constant 0 : i32
    %c0_i32_0 = arith.constant 0 : i32
    %c0_i32_1 = arith.constant 0 : i32
    return %c0_i32, %c0_i32_0 : i32, i32
  }
  func.func @transform_5(%arg0: i32, %arg1: i32, %arg2: i32) -> (i32, i32, i32, i32) {
    %c0_i32 = arith.constant 0 : i32
    %c0_i32_0 = arith.constant 0 : i32
    %c0_i32_1 = arith.constant 0 : i32
    return %arg0, %arg1, %c0_i32, %c0_i32_0 : i32, i32, i32, i32
  }
  func.func @transform_6(%arg0: i32, %arg1: i32, %arg2: i32) -> (i32, i32, i32) {
    %c1_i32 = arith.constant 1 : i32
    %0 = arith.muli %arg1, %c1_i32 : i32
    %1 = arith.addi %0, %arg2 : i32
    %c0_i32 = arith.constant 0 : i32
    %c0_i32_0 = arith.constant 0 : i32
    return %arg0, %c0_i32, %1 : i32, i32, i32
  }
}

</mosaic_0001>

<bundles_post_ra>
// kernel: tpu_custom_call.1
= control target key start
LH: loop header
LB: loop body
LE: loop exit
PB: predicated region body
PF: predicated region fallthrough
CT: control target
= control target key end

     0   :  { %12 = vsyncpa [#allocation5], 0  ;;  %s1499_s0 = inlined_call_operand.hbm [shape: f32[2,32,64], index: 0, kind: input, shape index: {}]   ;;  %s1500_s1 = inlined_call_operand.vmem [shape: f32[16,32], index: 1, kind: input, shape index: {}]   ;;  %s1501_s2 = inlined_call_operand.vmem [shape: f32[16,1], index: 2, kind: input, shape index: {}]   ;;  %s1502_s3 = inlined_call_operand.vmem [shape: f32[16,1], index: 3, kind: input, shape index: {}]   ;;  %s1503_s4 = inlined_call_operand.vmem [shape: f32[16,32], index: 4, kind: input, shape index: {}]   ;;  %s1504_s5 = inlined_call_operand.hbm [shape: f32[2,1,16,32], index: 5, kind: output, shape index: {0}]   ;;  %s1505_s6 = inlined_call_operand.hbm [shape: f32[2,16,64], index: 6, kind: output, shape index: {1}]  }
   0x1   :  { %14 = vsyncpa [#allocation5 + $0x1], 0 }
   0x2   :  { %15 = vsyncpa [#allocation6], 0 }
   0x3   :  { %17 = vsyncpa [#allocation6 + $0x1], 0 }
   0x4   :  { %18 = vsyncpa [#allocation9], 0 }
   0x5   :  { %20 = vsyncpa [#allocation9 + $0x1], 0  ;;  %s1191_s21 = smov 0   ;;  %s1193_s22 = smov 0  }
   0x6   :  { %s1195_s23 = smov 0   ;;  %s1197_s24 = smov 0  }
   0x7   :  { %s1199_s25 = smov 0   ;;  %s1201_s26 = smov 0  }
   0x8 LB: > { %s843_s27 = sadd.s32 4294967295, %s1145_s26   ;;  %s844_s28 = sadd.s32 4294967294, %s1145_s26   ;;  %s1145_s26 = sphi %s1201_s26, %s26_s26   ;;  %s1141_s25 = sphi %s1199_s25, %s1520_s25   ;;  %s1137_s24 = sphi %s1197_s24, %s1519_s24   ;;  %s1133_s23 = sphi %s1195_s23, %s1518_s23   ;;  %s1129_s22 = sphi %s1193_s22, %s1517_s22   ;;  %s1125_s21 = sphi %s1191_s21, %s1516_s21  }
   0x9   : > { %s45_s29 = sadd.s32 1, %s1141_s25  ;;  %s56_s30 = sadd.s32 1, %s1133_s23 }
   0xa   : > { %p47_p0 = scmp.ge.s32.totalorder %s45_s29, 2  ;;  %p63_p1 = scmp.ne.s32.totalorder %s1133_s23, %s1129_s22 }
   0xb   : > { %p64_p2 = scmp.eq.s32.totalorder %s1145_s26, 0  ;;  %p69_p3 = scmp.ne.s32.totalorder %s1129_s22, %s1125_s21 }
   0xc   : > { %s1522_s29 = smov (%p47_p0, %s45_s29), 0  ;;  %p70_p5 = scmp.eq.s32.totalorder %s843_s27, 0 }
   0xd   : > { %p1232_p4 = por %p64_p2, %p63_p1  ;;  %s51_s8 = ssub.s32 %s1141_s25, %s1522_s29 }
   0xe   : > { %p179_p6 = scmp.eq.s32.totalorder %s843_s27, 1  ;;  %p54_p7 = scmp.eq.s32.totalorder %s51_s8, 0 }
   0xf   : > { %p1238_p8 = por %p70_p5, %p69_p3  ;;  %p185_p10 = scmp.eq.s32.totalorder %s844_s28, 1 }
  0x10   : > { %p1242_p9 = por %p179_p6, %p63_p1  ;;  %p937_p13 = scmp.lt.s32.totalorder %s1145_s26, 2 }
  0x11   : > { %s1247_s11 = scalar_select %p54_p7, %s1133_s23, %s56_s30  }
  0x12   : > { %s1509_s10 = scalar_select %p1242_p9, 1, 0 }
  0x13   : > { %p1249_p11 = por %p185_p10, %p69_p3  ;;  %s247_s13 = sand.u32 1, %s1133_s23  }
  0x14   : > { %s847_s14 = sshll.u32 %s247_s13, 5  ;;  %s870_s15 = sshll.u32 %s1141_s25, 9 }
  0x15   : > { %s1510_s12 = scalar_select %p1249_p11, 1, 0 }
  0x16   : > { %s1260_s18 = scalar_lea.hbm %s1499_s0, %s870_s15  ;;  %s251_s19 = scalar_lea.vmem [#allocation4], %s847_s14 }
  0x17   : > { %s260_s20 = sshll.u32 %s251_s19, 4  ;;  %p1266_p0 = pnand %p937_p13, %p1232_p4  ;;  %s1262_s20 = int_to_ptr.vmem [resolvable:$true] %s260_s20 }
  0x18   : > { %s1271_s28 = scalar_lea.sflag [#allocation5], %s247_s13  ;;  %s1001_s30 = scalar_lea.hbm %s1260_s18, 512 }
  0x19   : > { %p1002_p2 = scmp.ne.s32.totalorder %s1260_s18, %s1001_s30  ;;  %p1003_p3 = pneg %p1266_p0 }
  0x1a   : > { %s1006_s7 = scalar_lea.hbm %s1499_s0, 1024  ;;  %p1007_p4 = scmp.lt.u32.totalorder %s1260_s18, %s1499_s0 }
  0x1b   : > { %p1004_p5 = pnand %p1003_p3, %p1002_p2  ;;  %p1008_p7 = scmp.lt.u32.totalorder %s1006_s7, %s1001_s30 }
  0x1c   : > { %p1010_p13 = scmp.lt.u32.totalorder %s1001_s30, %s1260_s18 }
  0x1d   : > { %p1005_p6 = pneg %p1004_p5  ;;  %p1009_p10 = por %p1008_p7, %p1007_p4 }
  0x1f   : > { %p1011_p12 = por %p1010_p13, %p1009_p10 }
  0x21   : > { %p1012_p1 = pnand %p1011_p12, %p1005_p6 }
  0x23   : > { %1015 = shalt.err (!%p1012_p1)
}
  0x24   : > { %s1016_s13 = scalar_lea.vmem %s1262_s20, 512  ;;  %s1147_s17 = smov [#allocation4]  }
  0x25   : > { %p1017_p2 = scmp.ne.s32.totalorder %s1262_s20, %s1016_s13  ;;  %s1021_s19 = sshll.u32 %s1147_s17, 4  ;;  %s1022_s19 = int_to_ptr.vmem [resolvable:$false] %s1021_s19 }
  0x26   : > { %s1023_s8 = scalar_lea.vmem %s1022_s19, 1024  ;;  %p1024_p9 = scmp.lt.s32.totalorder %s1262_s20, %s1022_s19 }
  0x27   : > { %p1019_p5 = pnand %p1017_p2, %p1003_p3  ;;  %p1025_p4 = scmp.lt.s32.totalorder %s1023_s8, %s1016_s13 }
  0x29   : > { %p1020_p11 = pneg %p1019_p5  ;;  %p1026_p7 = por %p1025_p4, %p1024_p9 }
  0x2b   : > { %p1027_p10 = pnand %p1026_p7, %p1020_p11 }
  0x2d   : > { %1030 = shalt.err (!%p1027_p10)
}
  0x2e   : > { %s1148_s30 = smov 128   ;;  %s1149_s14 = smov 8  }
  0x2f   : > { %929 = dma.hbm_to_vmem [thread:$0]  (!%p1266_p0), %s1260_s18, 512, %s1262_s20, %s1271_s28, %s1148_s30, %s1148_s30, %s1149_s14  }
  0x30   : > { %p268_p12 = scmp.lt.s32.totalorder %s1145_s26, 3  ;;  %p1512_p1 = scmp.ge.s32.totalorder %s1145_s26, 1 }
  0x32   : > { %p269_p3 = pnand %p1512_p1, %p268_p12 }
  0x33   : > { %s1303_s7 = sand.u32 (!%p269_p3), 1, %s1129_s22  }
  0x34   : > { %272 = sbr.rel (%p269_p3) target bundleno = 736 (0x2e0), region = 40  ;;  %s851_s15 = sshll.u32 (!%p269_p3), %s1303_s7, 5 }
  0x35   : > { %s275_s16 = scalar_lea.sflag (!%p269_p3), [#allocation5], %s1303_s7  ;;  %s278_s13 = scalar_lea.vmem (!%p269_p3), [#allocation4], %s851_s15 }
  0x3b   : > { %1112 = dma.done.wait (%p1238_p8), %s275_s16, 512  }
  0x3c   : > { %1114 = vsyncadd (%p1238_p8), %s275_s16, 4294966784  ;;  %v1150_v0 = vmov 0   ;;  %vm354_vm0 = vcmask 261120   ;;  %v332_v1 = vld [vmem:[%s278_s13] sm:$0xff]  ;;  %v1311_v2 = vld [vmem:[%s278_s13 + $0x8] sm:$0xff]  ;;  %vm340_vm1 = vcmask 523264  }
  0x3d   : > { %993 = vset.pattern.permute.xlu0 %v1150_v0  ;;  %994 = vset.pattern.permute.xlu1 %v1150_v0  ;;  %v1313_v3 = vld [vmem:[%s278_s13 + $0x10] sm:$0xff]  ;;  %v906_v4 = vpack.c.bf16 %v1311_v2, %v332_v1  ;;  %v1316_v5 = vld [vmem:[%s278_s13 + $0x18] sm:$0xff]  ;;  %vm323_vm2 = vcmask 7168   ;;  %v1151_v13 = vmov 0.0   ;;  %v336_v14 = vmul.f32 %v332_v1, %v332_v1  ;;  %s852_s13 = sshll.u32 %s1303_s7, 4  ;;  %vm915_vm3 = vmpackc.low %vm340_vm1, %vm340_vm1  ;;  %s871_s20 = sshll.u32 %s1137_s24, 8 }
  0x3e   : > { %v326_v6 = vld [vmem:[%s1500_s1] sm:$0xff]  ;;  %900 = vmatprep.mubr.msk.f32.mxu1 %vm340_vm1, %v332_v1  ;;  %v910_v7 = vpack.c.bf16 %v1316_v5, %v1313_v3  ;;  %v331_v10 = vld [vmem:[%s1502_s3 + $0x8] sm:$0xff]  ;;  %325 = vst.msk [vmem:[#allocation3 + $0x8] sm:$0xff] %vm323_vm2, %v1151_v13  ;;  %324 = vst.msk [vmem:[#allocation3] sm:$0xff] %vm323_vm2, %v1151_v13  ;;  %v337_v15 = vmul.f32 %v1311_v2, %v1311_v2  ;;  %v338_v18 = vmul.f32 %v1313_v3, %v1313_v3  ;;  %s1365_s18 = scalar_lea.vmem [#allocation8], %s852_s13  ;;  %vm318_vm4 = vcmask 130048   ;;  %s1399_s17 = scalar_lea.hbm %s1505_s6, %s871_s20 }
  0x3f   : > { %893 = vmatprep.mubr.msk.f32.mxu0 %vm354_vm0, %v326_v6  ;;  %v330_v8 = vld [vmem:[%s1502_s3] sm:$0xff]  ;;  %907 = vmatprep.subr.bf16.mxu0 %v906_v4  ;;  %v329_v11 = vld [vmem:[%s1501_s2 + $0x8] sm:$0xff]  ;;  %v341_v16 = vsel %vm340_vm1, %v336_v14, 0.0  ;;  %v339_v20 = vmul.f32 %v1316_v5, %v1316_v5  ;;  %320 = vst.msk [vmem:[#allocation2 + $0x8] sm:$0xff] %vm318_vm4, %v1151_v13  ;;  %319 = vst.msk [vmem:[#allocation2] sm:$0xff] %vm318_vm4, %v1151_v13  ;;  %s718_s9 = sshll.u32 %s1365_s18, 4  ;;  %s1401_s9 = int_to_ptr.vmem [resolvable:$true] %s718_s9 }
  0x40   : > { %v328_v9 = vld [vmem:[%s1501_s2] sm:$0xff]  ;;  %438 = vperm.xlu0 %993, %v330_v8   ;;  %909 = vmatpush3.bf16.msra.mxu0 %v906_v4  ;;  %v327_v12 = vld [vmem:[%s1500_s1 + $0x8] sm:$0xff]  ;;  %v342_v17 = vsel %vm340_vm1, %v337_v15, 0.0  ;;  %v344_v21 = vsel %vm340_vm1, %v338_v18, 0.0  ;;  %321 = vst.msk [vmem:[#allocation2 + $0x10] sm:$0xff] %vm318_vm4, %v1151_v13  ;;  %322 = vst.msk [vmem:[#allocation2 + $0x18] sm:$0xff] %vm318_vm4, %v1151_v13 }
  0x41   : > { %450 = vperm.xlu1 %994, %v328_v9   ;;  %911 = vmatprep.subr.bf16.mxu0 %v910_v7  ;;  %v343_v19 = vadd.f32 %v342_v17, %v341_v16  ;;  %v346_v23 = vsel %vm340_vm1, %v339_v20, 0.0  ;;  %s685_s19 = scalar_lea.sflag [#allocation9], %s1303_s7  ;;  %s1031_s8 = scalar_lea.vmem %s1401_s9, 256 }
  0x42   : > { %p1032_p8 = scmp.ne.s32.totalorder %s1401_s9, %s1031_s8  ;;  %p1513_p9 = scmp.ne.s32.totalorder %s1509_s10, 0 }
  0x43   : > { %v345_v22 = vadd.f32 %v344_v21, %v343_v19  ;;  %s1152_s30 = smov [#allocation8]  }
  0x44   : > { %443 = vperm.xlu0 %993, %v331_v10   ;;  %913 = vmatpush3.bf16.msra.mxu0 %v910_v7  ;;  %p1033_p11 = pnand %p1032_p8, %p1513_p9  ;;  %s1035_s14 = sshll.u32 %s1152_s30, 4  ;;  %s1036_s14 = int_to_ptr.vmem [resolvable:$false] %s1035_s14 }
  0x45   : > { %455 = vperm.xlu1 %994, %v329_v11   ;;  %v347_v24 = vadd.f32 %v346_v23, %v345_v22  ;;  %s1037_s15 = scalar_lea.vmem %s1036_s14, 512  ;;  %p1038_p6 = scmp.lt.s32.totalorder %s1401_s9, %s1036_s14 }
  0x46   : > { %v595_v18 = vld [vmem:[#allocation2 + $0x8] sm:$0xff]  ;;  %v594_v19 = vld [vmem:[#allocation2] sm:$0xff]  ;;  %p1034_p0 = pneg %p1033_p11  ;;  %p1039_p13 = scmp.lt.s32.totalorder %s1037_s15, %s1031_s8 }
  0x47   : > { %894 = vmatmul.mubr.msk.f32.vlgmr.msra.gmra.mrb[0].mxu0 %vm354_vm0, %v327_v12  ;;  %v348_v25 = vrot.slane %v347_v24, 4  ;;  %v607_v12 = vld [vmem:[#allocation3] sm:$0xff]  ;;  %v597_v23 = vld [vmem:[#allocation2 + $0x18] sm:$0xff] }
  0x48   : > { %p1040_p2 = por %p1039_p13, %p1038_p6 }
  0x49   : > { %v349_v26 = vadd.f32 %v348_v25, %v347_v24  ;;  %v596_v24 = vld [vmem:[#allocation2 + $0x10] sm:$0xff] }
  0x4a   : > { %p1041_p5 = pnand %p1040_p2, %p1034_p0 }
  0x4b   : > { %v350_v27 = vrot.slane %v349_v26, 2 }
  0x4d   : > { %v351_v28 = vadd.f32 %v350_v27, %v349_v26 }
  0x4f   : > { %v352_v30 = vrot.slane %v351_v28, 1 }
  0x51   : > { %v353_v32 = vadd.f32 %v352_v30, %v351_v28 }
  0xbf   : > { %v439_v29 = vpop.permute.xlu0 %438 }
  0xc0   : > { %v451_v31 = vpop.permute.xlu1 %450  ;;  %v446_v35 = vmul.f32 %v439_v29, %v353_v32 }
  0xc2   : > { %v458_v38 = vadd.f32 %v451_v31, %v446_v35 }
  0xc3   : > { %v444_v33 = vpop.permute.xlu0 %443 }
  0xc4   : > { %v447_v34 = vmul.f32 %v444_v33, %v353_v32  ;;  %v456_v36 = vpop.permute.xlu1 %455 }
  0xc6   : > { %v459_v37 = vadd.f32 %v456_v36, %v447_v34 }
 0x11a   : > { %v895_v39 = vpop.f32.mrb[0].mxu0 }
 0x11b   : > { %v461_v40 = vadd.f32 %v895_v39, %v459_v37  ;;  %v427_v41 = vpop.f32.mrb[1].mxu0 }
 0x11c   : > { %v460_v42 = vadd.f32 %v458_v38, %v427_v41 }
 0x11d   : > { %v463_v43 = vsel %vm340_vm1, %v461_v40, -inf }
 0x11e   : > { %v462_v44 = vsel %vm340_vm1, %v460_v42, -inf }
 0x11f   : > { %v464_v45 = vmax.f32 %v462_v44, %v463_v43 }
 0x121   : > { %v465_v46 = vrot.slane %v464_v45, 4 }
 0x123   : > { %v466_v47 = vmax.f32 %v464_v45, %v465_v46 }
 0x125   : > { %v467_v48 = vrot.slane %v466_v47, 2 }
 0x127   : > { %v468_v49 = vmax.f32 %v466_v47, %v467_v48 }
 0x129   : > { %v469_v50 = vrot.slane %v468_v49, 1 }
 0x12b   : > { %v470_v51 = vmax.f32 %v468_v49, %v469_v50 }
 0x12d   : > { %v471_v52 = vsub.f32 %v460_v42, %v470_v51  ;;  %v472_v53 = vsub.f32 %v461_v40, %v470_v51 }
 0x12f   : > { %v473_v54 = vmul.f32 1.442695, %v471_v52  ;;  %v475_v55 = vmul.f32 1.442695, %v472_v53 }
 0x131   : > { %995 = vpow2.f32 %v473_v54 }
 0x132   : > { %997 = vpow2.f32 %v475_v55 }
 0x13b   : > { %v996_v56 = vpop.eup %995 }
 0x13c   : > { %v998_v57 = vpop.eup %997  ;;  %v477_v58 = vsel %vm340_vm1, %v996_v56, 0.0 }
 0x13d   : > { %v478_v59 = vsel %vm340_vm1, %v998_v57, 0.0 }
 0x13e   : > { %v479_v60 = vadd.f32 %v478_v59, %v477_v58 }
 0x140   : > { %v480_v61 = vrot.slane %v479_v60, 4 }
 0x142   : > { %v481_v62 = vadd.f32 %v480_v61, %v479_v60 }
 0x144   : > { %v482_v63 = vrot.slane %v481_v62, 2 }
 0x146   : > { %v483_v0 = vadd.f32 %v482_v63, %v481_v62 }
 0x148   : > { %v484_v1 = vrot.slane %v483_v0, 1 }
 0x14a   : > { %v485_v4 = vadd.f32 %v484_v1, %v483_v0 }
 0x14c   : > { %999 = vrcp.f32 %v485_v4 }
 0x156   : > { %v1000_v6 = vpop.eup %999 }
 0x157   : > { %v488_v7 = vmul.f32 %v1000_v6, %v998_v57  ;;  %v487_v8 = vmul.f32 %v1000_v6, %v996_v56 }
 0x159   : > { %v612_v9 = vsel %vm340_vm1, %v488_v7, 0.0  ;;  %490 = vst.msk [vmem:[%s1365_s18 + $0x8] sm:$0xff] %vm340_vm1, %v488_v7  ;;  %v609_v10 = vsel %vm340_vm1, %v487_v8, 0.0  ;;  %489 = vst.msk [vmem:[%s1365_s18] sm:$0xff] %vm340_vm1, %v487_v8  ;;  %v914_v11 = vpack.c.bf16 %v488_v7, %v487_v8 }
 0x15a   : > { %613 = vadd.xlane.f32.xlu1 %v612_v9  ;;  %610 = vadd.xlane.f32.xlu0 %v609_v10 }
 0x15b   : > { %916 = vmatprep.subr.msk.bf16.mxu1 %vm915_vm3, %v914_v11 }
 0x15c   : > { %919 = vmatpush3.bf16.xpose.msk.msra.mxu1 %vm915_vm3, %v914_v11 }
 0x163   : > { %901 = vmatmul.mubr.msk.f32.vlgmr.msra.gmra.mrb[0].mxu1 %vm340_vm1, %v1311_v2  ;;  %v608_v2 = vld [vmem:[#allocation3 + $0x8] sm:$0xff] }
 0x164   : > { %903 = vmatprep.mubr.msk.f32.mxu1 %vm340_vm1, %v1313_v3 }
 0x167   : > { %904 = vmatmul.mubr.msk.f32.gmra.mrb[2].mxu1 %vm340_vm1, %v1316_v5 }
 0x1e7   : > { %v614_v14 = vpop.xlane.xlu1 %613  ;;  %v611_v3 = vpop.xlane.xlu0 %610 }
 0x1e8   : > { %v616_v15 = vadd.f32 %v614_v14, %v608_v2  ;;  %v615_v16 = vadd.f32 %v611_v3, %v607_v12 }
 0x1ea   : > { %619 = vst.msk [vmem:[#allocation3 + $0x8] sm:$0xff] %vm323_vm2, %v616_v15  ;;  %618 = vst.msk [vmem:[#allocation3] sm:$0xff] %vm323_vm2, %v615_v16 }
 0x1f1   : > { %v660_v5 = vld [vmem:[#allocation3 + $0x8] sm:$0xff]  ;;  %v659_v17 = vld [vmem:[#allocation3] sm:$0xff] }
 0x1f2   : > { %670 = vperm.xlu1 %994, %v660_v5   ;;  %665 = vperm.xlu0 %993, %v659_v17  }
 0x236   : > { %v902_v20 = vpop.f32.mrb[0].mxu1 }
 0x237   : > { %v599_v21 = vadd.f32 %v902_v20, %v595_v18  ;;  %v575_v22 = vpop.f32.mrb[1].mxu1 }
 0x238   : > { %v598_v13 = vadd.f32 %v594_v19, %v575_v22 }
 0x239   : > { %604 = vst.msk [vmem:[#allocation2 + $0x8] sm:$0xff] %vm318_vm4, %v599_v21 }
 0x23a   : > { %603 = vst.msk [vmem:[#allocation2] sm:$0xff] %vm318_vm4, %v598_v13  ;;  %v905_v25 = vpop.f32.mrb[2].mxu1 }
 0x23b   : > { %v601_v26 = vadd.f32 %v905_v25, %v597_v23  ;;  %v585_v27 = vpop.f32.mrb[3].mxu1 }
 0x23c   : > { %v600_v28 = vadd.f32 %v596_v24, %v585_v27 }
 0x23d   : > { %606 = vst.msk [vmem:[#allocation2 + $0x18] sm:$0xff] %vm318_vm4, %v601_v26 }
 0x23e   : > { %605 = vst.msk [vmem:[#allocation2 + $0x10] sm:$0xff] %vm318_vm4, %v600_v28 }
 0x240   : > { %v624_v30 = vld [vmem:[#allocation2 + $0x8] sm:$0xff] }
 0x241   : > { %v623_v29 = vld [vmem:[#allocation2] sm:$0xff] }
 0x242   : > { %627 = vxpose.xlu0.b32.start [1/4] (short) (narrow) %v623_v29, 16 }
 0x244   : > { %v626_v32 = vld [vmem:[#allocation2 + $0x18] sm:$0xff] }
 0x245   : > { %v625_v31 = vld [vmem:[#allocation2 + $0x10] sm:$0xff] }
 0x246   : > { %628 = vxpose.xlu0.b32.cont [2/4] (short) (narrow) %v624_v30, 16 }
 0x24a   : > { %629 = vxpose.xlu0.b32.cont [3/4] (short) (narrow) %v625_v31, 16 }
 0x24b   : > { %1044 = shalt.err (!%p1041_p5)
}
 0x24c   : > { %s1045_s16 = scalar_lea.hbm %s1399_s17, 256  ;;  %s1049_s28 = scalar_lea.hbm %s1505_s6, 512 }
 0x24d   : > { %p1046_p4 = scmp.ne.s32.totalorder %s1399_s17, %s1045_s16  ;;  %p1050_p12 = scmp.lt.u32.totalorder %s1399_s17, %s1505_s6 }
 0x24e   : > { %p1051_p1 = scmp.lt.u32.totalorder %s1049_s28, %s1045_s16  ;;  %p1053_p8 = scmp.lt.u32.totalorder %s1045_s16, %s1399_s17 }
 0x24f   : > { %p1047_p7 = pnand %p1046_p4, %p1513_p9 }
 0x250   : > { %p1052_p3 = por %p1051_p1, %p1050_p12 }
 0x251   : > { %p1048_p10 = pneg %p1047_p7 }
 0x252   : > { %p1054_p11 = por %p1053_p8, %p1052_p3 }
 0x254   : > { %p1055_p0 = pnand %p1054_p11, %p1048_p10 }
 0x256   : > { %1058 = shalt.err (!%p1055_p0)
}
 0x257   : > { %s1153_s8 = smov 128   ;;  %s1154_s15 = smov 8   ;;  %630 = vxpose.xlu0.b32.end [4/4] (short) (narrow) %v626_v32, 16  ;;  %v661_v33 = vld [vmem:[%s1503_s4] sm:$0xff]  ;;  %v662_v36 = vld [vmem:[%s1503_s4 + $0x8] sm:$0xff] }
 0x258   : > { %923 = dma.vmem_to_hbm [thread:$0]  (%p1513_p9), %s1401_s9, 256, %s1399_s17, %s685_s19, %s1153_s8, %s1153_s8, %s1154_s15  }
 0x259   : > { %s304_s30 = scalar_lea.vmem [#allocation7], %s852_s13  ;;  %s1446_s19 = scalar_lea.hbm %s1504_s5, %s871_s20 }
 0x25a   : > { %s700_s14 = sshll.u32 %s304_s30, 4  ;;  %s680_s13 = scalar_lea.sflag [#allocation6], %s1303_s7  ;;  %s1439_s14 = int_to_ptr.vmem [resolvable:$true] %s700_s14 }
 0x25b   : > { %s1059_s18 = scalar_lea.vmem %s1439_s14, 256  ;;  %s1155_s16 = smov [#allocation7]  }
 0x25c   : > { %p1060_p6 = scmp.ne.s32.totalorder %s1439_s14, %s1059_s18  ;;  %s1063_s27 = sshll.u32 %s1155_s16, 4  ;;  %s1064_s27 = int_to_ptr.vmem [resolvable:$false] %s1063_s27 }
 0x25d   : > { %s1065_s28 = scalar_lea.vmem %s1064_s27, 512  ;;  %p1066_p5 = scmp.lt.s32.totalorder %s1439_s14, %s1064_s27 }
 0x25e   : > { %p1061_p13 = pnand %p1060_p6, %p1513_p9  ;;  %p1067_p4 = scmp.lt.s32.totalorder %s1065_s28, %s1059_s18 }
 0x260   : > { %p1062_p2 = pneg %p1061_p13  ;;  %p1068_p7 = por %p1067_p4, %p1066_p5 }
 0x262   : > { %p1069_p10 = pnand %p1068_p7, %p1062_p2 }
 0x271   : > { %v666_v34 = vpop.permute.xlu0 %665  ;;  %v671_v37 = vpop.permute.xlu1 %670 }
 0x272   : > { %v673_v35 = vmul.f32 %v666_v34, %v661_v33  ;;  %v674_v40 = vmul.f32 %v671_v37, %v662_v36 }
 0x2cb   : > { %v643_v38 = vpop.trf.xlu0 }
 0x2cc   : > { %v675_v39 = vsub.f32 %v643_v38, %v673_v35 }
 0x2ce   : > { %677 = vst.msk [vmem:[%s304_s30] sm:$0xff] %vm354_vm0, %v675_v39 }
 0x2cf   : > { %v644_v41 = vpop.trf.xlu0 }
 0x2d0   : > { %v676_v42 = vsub.f32 %v644_v41, %v674_v40 }
 0x2d2   : > { %678 = vst.msk [vmem:[%s304_s30 + $0x8] sm:$0xff] %vm354_vm0, %v676_v42 }
 0x2d3   : > { %1072 = shalt.err (!%p1069_p10)
}
 0x2d4   : > { %s1073_s24 = scalar_lea.hbm %s1446_s19, 256  ;;  %s1077_s9 = scalar_lea.hbm %s1504_s5, 512 }
 0x2d5   : > { %p1074_p12 = scmp.ne.s32.totalorder %s1446_s19, %s1073_s24  ;;  %p1078_p8 = scmp.lt.u32.totalorder %s1446_s19, %s1504_s5 }
 0x2d6   : > { %p1079_p11 = scmp.lt.u32.totalorder %s1077_s9, %s1073_s24  ;;  %p1081_p6 = scmp.lt.u32.totalorder %s1073_s24, %s1446_s19 }
 0x2d7   : > { %p1075_p1 = pnand %p1074_p12, %p1513_p9 }
 0x2d8   : > { %p1080_p0 = por %p1079_p11, %p1078_p8 }
 0x2d9   : > { %p1076_p3 = pneg %p1075_p1 }
 0x2da   : > { %p1082_p13 = por %p1081_p6, %p1080_p0 }
 0x2dc   : > { %p1083_p2 = pnand %p1082_p13, %p1076_p3 }
 0x2de   : > { %1086 = shalt.err (!%p1083_p2)
}
 0x2df   : > { %922 = dma.vmem_to_hbm [thread:$0]  (%p1513_p9), %s1439_s14, 256, %s1446_s19, %s680_s13, %s1153_s8, %s1153_s8, %s1154_s15  }
 0x2e0 PF: > { %s733_s18 = sand.u32 1, %s1125_s21   ;;  %p1514_p5 = scmp.ne.s32.totalorder %s1510_s12, 0 }
 0x2e1   : > { %p1515_p4 = scmp.ge.s32.totalorder %s1145_s26, 2  ;;  %s734_s27 = scalar_lea.sflag [#allocation6], %s733_s18 }
 0x2e3   : > { %p931_p7 = pnand %p1515_p4, %p1514_p5 }
 0x2e5   : > { %1116 = dma.done.wait (!%p931_p7), %s734_s27, 256  }
 0x2e6   : > { %1118 = vsyncadd (!%p931_p7), %s734_s27, 4294967040  ;;  %s743_s10 = scalar_lea.sflag [#allocation9], %s733_s18 }
 0x2e7   : > { %1120 = dma.done.wait (!%p931_p7), %s743_s10, 256  }
 0x2e8   : > { %1122 = vsyncadd (!%p931_p7), %s743_s10, 4294967040  ;;  %s26_s26 = sadd.s32 1, %s1145_s26   ;;  %s1516_s21 = smov %s1129_s22 }
 0x2e9   : > { %p23_p10 = scmp.ge.s32.totalorder %s26_s26, 4   ;;  %s1517_s22 = smov %s1133_s23 }
 0x2ea   : > { %s1518_s23 = smov %s1247_s11  ;;  %s1519_s24 = smov %s1141_s25 }
 0x2eb   : > { %s1520_s25 = smov %s1522_s29  ;;  %25 = sbr.rel (!%p23_p10) target bundleno = 8 (0x8), region = 110 }
 0x2f2   :  { %748 = vsyncpa [#allocation5], 1 }
 0x2f3   :  { %750 = vsyncpa [#allocation5 + $0x1], 1 }
 0x2f4   :  { %751 = vsyncpa [#allocation6], 1 }
 0x2f5   :  { %753 = vsyncpa [#allocation6 + $0x1], 1 }
 0x2f6   :  { %754 = vsyncpa [#allocation9], 1 }
 0x2f7   :  { %756 = vsyncpa [#allocation9 + $0x1], 1 }

</bundles_post_ra>
